<compile_context>
chip_gen: v6e
topology: v6e:2x2x1
jax: 0.10.0
libtpu: 0.0.40
codegen_flags: <defaults>
</compile_context>

<pallas_src>
import numpy as np
import jax
import jax.numpy as jnp
from jax import lax
from jax.experimental import pallas as pl
from jax.experimental.pallas import tpu as pltpu

NUM_SPLITS = 2      # leading "parallel" grid axis (2 TensorCores on v7x; serial & harmless elsewhere)
_LANE = 128
_SUBLANE = 8


def _round_up(a, b):
    return ((a + b - 1) // b) * b


def _dot_nt(a, b):
    """(T, C) x (M, C) -> (T, M), contracting the feature axis on the MXU (f32 accumulate)."""
    return lax.dot_general(a, b, (((1,), (1,)), ((), ())),
                           preferred_element_type=jnp.float32)


# --------------------------------------------------------------------------- kernels
def _euc_kernel(x_ref, xn_ref, pid_ref, h_ref, hn_ref, pidhc_ref, out_ref, acc_ref):
    i = pl.program_id(1)

    @pl.when(i == 0)
    def _init():
        acc_ref[...] = jnp.zeros_like(acc_ref)

    cross = _dot_nt(x_ref[...], h_ref[...])                    # (T, Mp)  MXU, f32 acc
    d2 = xn_ref[...] + hn_ref[...] - 2.0 * cross               # (T,1)+(1,Mp) broadcasts
    dist = jnp.sqrt(jnp.maximum(d2, 1e-12))
    sel = pid_ref[...] == pidhc_ref[...]                       # (T, Mp) selection mask
    acc_ref[...] += jnp.sum(jnp.where(sel, dist, 0.0), axis=0, keepdims=True)

    @pl.when(i == pl.num_programs(1) - 1)
    def _store():                                              # one lane-dense write per core
        out_ref[...] = acc_ref[...][None]


def _kl_kernel(x_ref, sx_ref, pid_ref, h_ref, lh_ref, sh_ref, pidhc_ref, out_ref, acc_ref):
    i = pl.program_id(1)

    @pl.when(i == 0)
    def _init():
        acc_ref[...] = jnp.zeros_like(acc_ref)

    x = x_ref[...]                                             # softmax probs, stream dtype
    lx = jnp.log(jnp.maximum(x.astype(jnp.float32), 1e-9))     # (T, C) f32 (EUP)
    cross_x_lh = _dot_nt(x, lh_ref[...])                       # stream-dtype MXU
    cross_lx_h = _dot_nt(lx, h_ref[...])                       # f32 MXU vs resident f32 h
    dist = sx_ref[...] + sh_ref[...] - cross_x_lh - cross_lx_h
    sel = pid_ref[...] == pidhc_ref[...]
    acc_ref[...] += jnp.sum(jnp.where(sel, dist, 0.0), axis=0, keepdims=True)

    @pl.when(i == pl.num_programs(1) - 1)
    def _store():
        out_ref[...] = acc_ref[...][None]


# --------------------------------------------------------------------------- wrapper
def cccc_forward(x, pids, d="euc", margin_euc=0.6, margin_kl=6.0,
                 stream_dtype=None, max_rows_per_tile=None):
    """Forward of the PyTorch `cccc` module (margins exist but are unused in forward)."""
    del margin_euc, margin_kl

    if d not in ("euc", "kl"):
        raise ValueError(f"unknown distance {d!r}")

    pids_np = np.asarray(pids)
    x = jnp.asarray(x)
    N, C = x.shape
    p = int(len(np.unique(pids_np)))
    M = 2 * p
    if N % M != 0:
        raise ValueError("N must be divisible by 2 * num_unique_pids (as in the torch module)")
    K = N // M

    if stream_dtype is None:
        stream_dtype = x.dtype if x.dtype in (np.dtype("float32"), np.dtype("bfloat16")) \
            else np.dtype("float32")
    stream_dtype = np.dtype(stream_dtype)
    itemsize = stream_dtype.itemsize

    # ---- host-side selection bookkeeping (depends only on pids) ---------------------
    # Encode "same pid AND same row/column half" as equality of two small int32 codes,
    # so the kernel streams one int32 per row instead of an (N, M) weight matrix.
    _, inv = np.unique(pids_np, return_inverse=True)
    pid_c = inv.astype(np.int32).reshape(N)
    pidhc_c = pid_c.reshape(M, -1)[:, 0]
    pid_eff = pid_c + p * (np.arange(N) >= N // 2).astype(np.int32)         # [0, 2p)
    pidhc_eff = pidhc_c + p * (np.arange(M) >= M // 2).astype(np.int32)     # [0, 2p)
    cnt = float(np.sum(pid_eff[:, None] == pidhc_eff[None, :]))             # selected count

    # ---- hoisted preprocessing: one fused XLA pass over x ---------------------------
    xf = x.astype(jnp.float32)
    if d == "kl":
        xf = jax.nn.softmax(xf, axis=-1)
    h32 = jnp.mean(xf.reshape(M, K, C), axis=1)                 # (M, C) half centers

    if d == "euc":
        row_aux = jnp.sum(xf * xf, axis=1, keepdims=True)       # ||x_i||^2   (N, 1)
        col_aux = jnp.sum(h32 * h32, axis=1)                    # ||h_j||^2   (M,)
        lh32 = None
    else:
        lxf = jnp.log(jnp.maximum(xf, 1e-9))
        row_aux = jnp.sum(xf * lxf, axis=1, keepdims=True)      # sum x log x (N, 1)
        lh32 = jnp.log(jnp.maximum(h32, 1e-9))
        col_aux = jnp.sum(h32 * lh32, axis=1)                   # sum h log h (M,)

    c_pad = _round_up(C, _LANE)
    m_pad = _round_up(M, _LANE)       # lane-dense centers dim: contiguous DMAs, unmasked stores

    # ---- per-generation VMEM budget & per-mode live-set model -----------------------
    try:
        vmem_phys = int(pltpu.get_tpu_info().vmem_capacity_bytes)
        if vmem_phys <= 0:
            raise ValueError
    except Exception:                 # conservative fallback: v7x (64 MiB per TensorCore)
        vmem_phys = 64 << 20
    budget = (3 * vmem_phys) // 4     # ~96 MiB on v5e/v6e, ~48 MiB on v7x

    if d == "euc":
        resident = 2 * m_pad * c_pad * itemsize                 # h (double-buffered)
    else:
        resident = 2 * m_pad * c_pad * (4 + itemsize)           # f32 h + stream-dtype log(h)
    resident += 4 * _SUBLANE * m_pad * 4                        # hn/sh + pidhc row blocks

    per_row = 2 * c_pad * itemsize                              # x tile, double-buffered
    per_row += 2 * 2 * _LANE * 4                                # (T,1) aux + pid streams (lane-padded)
    per_row += 6 * m_pad * 4                                    # cross / dist / mask temporaries
    if d == "kl":
        per_row += c_pad * 4                                    # in-kernel f32 log(x) tile

    avail = (budget * 4) // 5 - resident - (2 << 20)
    tile_n = avail // per_row
    if max_rows_per_tile is not None:
        tile_n = min(tile_n, int(max_rows_per_tile))
    rows_per_core = -(-N // NUM_SPLITS)
    tile_n = min(tile_n, 4096, _round_up(rows_per_core, _SUBLANE))
    tile_n = max(_SUBLANE, (int(tile_n) // _SUBLANE) * _SUBLANE)
    inner = -(-rows_per_core // tile_n)
    n_pad = NUM_SPLITS * inner * tile_n

    est_total = resident + per_row * tile_n + (2 << 20)
    # TODO(synk): for very large M * C the resident h/lh alone can exceed the per-core
    # budget; the proper fix is tiling the centers over a third grid axis (not just
    # raising the declared limit).
    vmem_limit = int(min(max(budget, est_total), (vmem_phys * 9) // 10))

    # ---- padding (all pads are exact: softmax / log already applied) ----------------
    if c_pad != C:
        xf = jnp.pad(xf, ((0, 0), (0, c_pad - C)))
        h32 = jnp.pad(h32, ((0, 0), (0, c_pad - C)))
        if lh32 is not None:
            lh32 = jnp.pad(lh32, ((0, 0), (0, c_pad - C)))
    if m_pad != M:
        h32 = jnp.pad(h32, ((0, m_pad - M), (0, 0)))
        col_aux = jnp.pad(col_aux, (0, m_pad - M))
        if lh32 is not None:
            lh32 = jnp.pad(lh32, ((0, m_pad - M), (0, 0)))
    if n_pad != N:                    # padded rows carry a sentinel pid -> never selected
        xf = jnp.pad(xf, ((0, n_pad - N), (0, 0)))
        row_aux = jnp.pad(row_aux, ((0, n_pad - N), (0, 0)))

    pid_full = np.full((n_pad, 1), -2, np.int32)
    pid_full[:N, 0] = pid_eff
    pidhc_full = np.full((1, m_pad), -1, np.int32)
    pidhc_full[0, :M] = pidhc_eff

    x_stream = xf.astype(stream_dtype)
    row_aux = row_aux.astype(jnp.float32)
    col_aux = col_aux.reshape(1, m_pad).astype(jnp.float32)
    pid_arr = jnp.asarray(pid_full)
    pidhc_arr = jnp.asarray(pidhc_full)

    # ---- specs -----------------------------------------------------------------------
    x_spec = pl.BlockSpec((tile_n, c_pad), lambda c, i: (c * inner + i, 0))
    rowvec_spec = pl.BlockSpec((tile_n, 1), lambda c, i: (c * inner + i, 0))
    h_spec = pl.BlockSpec((m_pad, c_pad), lambda c, i: (0, 0))
    colvec_spec = pl.BlockSpec((1, m_pad), lambda c, i: (0, 0))
    out_spec = pl.BlockSpec((1, 1, m_pad), lambda c, i: (c, 0, 0))

    if d == "euc":
        kernel = _euc_kernel
        inputs = (x_stream, row_aux, pid_arr, h32.astype(stream_dtype), col_aux, pidhc_arr)
        in_specs = [x_spec, rowvec_spec, rowvec_spec, h_spec, colvec_spec, colvec_spec]
    else:
        kernel = _kl_kernel
        inputs = (x_stream, row_aux, pid_arr, h32.astype(jnp.float32),
                  lh32.astype(stream_dtype), col_aux, pidhc_arr)
        in_specs = [x_spec, rowvec_spec, rowvec_spec, h_spec, h_spec, colvec_spec, colvec_spec]

    out = pl.pallas_call(
        kernel,
        out_shape=jax.ShapeDtypeStruct((NUM_SPLITS, 1, m_pad), jnp.float32),
        grid=(NUM_SPLITS, inner),
        in_specs=in_specs,
        out_specs=out_spec,
        scratch_shapes=[pltpu.VMEM((1, m_pad), jnp.float32)],
        compiler_params=pltpu.CompilerParams(
            dimension_semantics=("parallel", "arbitrary"),
            vmem_limit_bytes=vmem_limit),
    )(*inputs)

    # masked sum / count  ==  torch.cat(selected).mean()
    return jnp.sum(out) / max(cnt, 1.0)


# --------------------------------------------------------------------------- reference
def _ref_forward(x, pids, d):
    """Pure-numpy reference mirroring the PyTorch code."""
    x = np.asarray(x, np.float32)
    pids = np.asarray(pids)
    p = len(np.unique(pids))
    c = x.shape[-1]
    if d == "kl":
        e = np.exp(x - x.max(-1, keepdims=True))
        x = e / e.sum(-1, keepdims=True)
    pidhc = pids.reshape(2 * p, -1)[:, 0]
    hcen = x.reshape(2 * p, -1, c).mean(1)
    if d == "euc":
        d2 = (x ** 2).sum(1, keepdims=True) + (hcen ** 2).sum(1)[None, :] - 2.0 * x @ hcen.T
        dist = np.sqrt(np.clip(d2, 1e-12, None))
    else:
        lx = np.log(np.clip(x, 1e-9, None))
        lh = np.log(np.clip(hcen, 1e-9, None))
        dist = (x * lx).sum(1)[:, None] + (hcen * lh).sum(1)[None, :] - x @ lh.T - lx @ hcen.T
    mask = pids[:, None] == pidhc[None, :]
    n, m = dist.shape
    vals = []
    for i in range(n // 2):
        vals.append(dist[i, : m // 2][mask[i, : m // 2]])
    for i in range(n // 2, n):
        vals.append(dist[i, m // 2:][mask[i, m // 2:]])
    return float(np.concatenate(vals).mean())


if __name__ == "__main__":
    key = jax.random.PRNGKey(0)

    # --- case 1: tiny shapes matching the module's expected layout --------------------
    n_ids, halves, k_per, C = 2, 2, 4, 32
    N = halves * n_ids * k_per                         # 16 samples
    pids = np.concatenate([np.repeat(np.arange(n_ids), k_per)] * halves).astype(np.int32)
    x = jax.random.normal(key, (N, C), dtype=jnp.float32)

    loss_euc = cccc_forward(x, pids, d="euc")
    loss_kl = cccc_forward(x, pids, d="kl")
    jax.block_until_ready((loss_euc, loss_kl))
    ref_euc = _ref_forward(np.asarray(x), pids, "euc")
    ref_kl = _ref_forward(np.asarray(x), pids, "kl")
    assert np.allclose(float(loss_euc), ref_euc, rtol=2e-3, atol=1e-5), (float(loss_euc), ref_euc)
    assert np.allclose(float(loss_kl), ref_kl, rtol=2e-3, atol=1e-5), (float(loss_kl), ref_kl)

    # --- case 2: non-multiple-of-128 features, multi-step inner loop, padded rows -----
    key2 = jax.random.PRNGKey(1)
    n_ids2, k_per2, C2 = 3, 8, 160
    N2 = 2 * n_ids2 * k_per2                           # 48 samples
    pids2 = np.concatenate([np.repeat(np.arange(n_ids2), k_per2)] * 2).astype(np.int32)
    x2 = jax.random.normal(key2, (N2, C2), dtype=jnp.float32)
    l2_euc = cccc_forward(x2, pids2, d="euc", max_rows_per_tile=16)
    l2_kl = cccc_forward(x2, pids2, d="kl", max_rows_per_tile=16)
    jax.block_until_ready((l2_euc, l2_kl))
    r2_euc = _ref_forward(np.asarray(x2), pids2, "euc")
    r2_kl = _ref_forward(np.asarray(x2), pids2, "kl")
    assert np.allclose(float(l2_euc), r2_euc, rtol=2e-3, atol=1e-5), (float(l2_euc), r2_euc)
    assert np.allclose(float(l2_kl), r2_kl, rtol=2e-3, atol=1e-5), (float(l2_kl), r2_kl)

    # --- bf16 streaming: caller-provided bf16 and opt-in downcast, with tolerances ----
    x_bf16 = x.astype(jnp.bfloat16)
    ref_bf_euc = _ref_forward(np.asarray(x_bf16), pids, "euc")
    ref_bf_kl = _ref_forward(np.asarray(x_bf16), pids, "kl")
    lb_euc = cccc_forward(x_bf16, pids, d="euc")
    lb_kl = cccc_forward(x_bf16, pids, d="kl")
    lo_euc = cccc_forward(x, pids, d="euc", stream_dtype=jnp.bfloat16)   # opt-in for f32 callers
    jax.block_until_ready((lb_euc, lb_kl, lo_euc))
    assert np.allclose(float(lb_euc), ref_bf_euc, rtol=1e-1, atol=1e-2), (float(lb_euc), ref_bf_euc)
    assert np.allclose(float(lb_kl), ref_bf_kl, rtol=1e-1, atol=1e-2), (float(lb_kl), ref_bf_kl)
    assert np.allclose(float(lo_euc), ref_euc, rtol=1e-1, atol=1e-2), (float(lo_euc), ref_euc)

    print("KERNEL_OK")
</pallas_src>

<mosaic_0001>
module attributes {stable_mosaic.version = 11 : i64} {
  func.func @_euc_kernel(%arg0: i32, %arg1: i32, %arg2: memref<8x128xf32, #tpu.memory_space<vmem>>, %arg3: memref<8x1xf32, #tpu.memory_space<vmem>>, %arg4: memref<8x1xi32, #tpu.memory_space<vmem>>, %arg5: memref<128x128xf32, #tpu.memory_space<vmem>>, %arg6: memref<1x128xf32, #tpu.memory_space<vmem>>, %arg7: memref<1x128xi32, #tpu.memory_space<vmem>>, %arg8: memref<1x1x128xf32, #tpu.memory_space<vmem>>, %arg9: memref<1x128xf32, #tpu.memory_space<vmem>>) attributes {dimension_semantics = [#tpu.dimension_semantics<parallel>, #tpu.dimension_semantics<arbitrary>], iteration_bounds = array<i64: 2, 1>, scalar_prefetch = 0 : i64, scratch_operands = 1 : i64, tpu.core_type = #tpu.core_type<tc>, window_params = [{transform_indices = @transform_0, window_bounds = array<i64: 8, 128>}, {transform_indices = @transform_1, window_bounds = array<i64: 8, 1>}, {transform_indices = @transform_2, window_bounds = array<i64: 8, 1>}, {pipeline_mode = #tpu.pipeline_mode<synchronous>, transform_indices = @transform_3, window_bounds = array<i64: 128, 128>}, {pipeline_mode = #tpu.pipeline_mode<synchronous>, transform_indices = @transform_4, window_bounds = array<i64: 1, 128>}, {pipeline_mode = #tpu.pipeline_mode<synchronous>, transform_indices = @transform_5, window_bounds = array<i64: 1, 128>}, {transform_indices = @transform_6, window_bounds = array<i64: 1, 1, 128>}]} {
    %c0_i32 = arith.constant 0 : i32
    %0 = arith.cmpi eq, %arg1, %c0_i32 : i32
    %1 = arith.extui %0 : i1 to i32
    %c0_i32_0 = arith.constant 0 : i32
    %2 = arith.cmpi ne, %1, %c0_i32_0 : i32
    scf.if %2 {
      %cst_22 = arith.constant 0.000000e+00 : f32
      %32 = vector.broadcast %cst_22 : f32 to vector<1x128xf32>
      %c0_23 = arith.constant 0 : index
      %c0_24 = arith.constant 0 : index
      %33 = vector.load %arg9[%c0_23, %c0_24] : memref<1x128xf32, #tpu.memory_space<vmem>>, vector<1x128xf32>
      tpu.vector_store %arg9[%c0_23, %c0_24], %32 {strides = array<i32>} : memref<1x128xf32, #tpu.memory_space<vmem>>, vector<1x128xf32>,
    } else {
    }
    %c0 = arith.constant 0 : index
    %c0_1 = arith.constant 0 : index
    %3 = vector.load %arg2[%c0, %c0_1] : memref<8x128xf32, #tpu.memory_space<vmem>>, vector<8x128xf32>
    %c0_2 = arith.constant 0 : index
    %c0_3 = arith.constant 0 : index
    %4 = vector.load %arg5[%c0_2, %c0_3] : memref<128x128xf32, #tpu.memory_space<vmem>>, vector<128x128xf32>
    %cst = arith.constant dense<0.000000e+00> : vector<8x128xf32>
    %5 = tpu.matmul %3, %4, %cst {dimension_numbers = #tpu.dot_dimension_numbers<[1], [1], [0], [0], [0, 0, 1, 0], [], []>} : vector<8x128xf32>, vector<128x128xf32>, vector<8x128xf32> -> vector<8x128xf32>
    %c0_4 = arith.constant 0 : index
    %c0_5 = arith.constant 0 : index
    %6 = vector.load %arg3[%c0_4, %c0_5] : memref<8x1xf32, #tpu.memory_space<vmem>>, vector<8x1xf32>
    %c0_6 = arith.constant 0 : index
    %c0_7 = arith.constant 0 : index
    %7 = vector.load %arg6[%c0_6, %c0_7] : memref<1x128xf32, #tpu.memory_space<vmem>>, vector<1x128xf32>
    %8 = vector.broadcast %6 : vector<8x1xf32> to vector<8x128xf32>
    %9 = vector.broadcast %7 : vector<1x128xf32> to vector<8x128xf32>
    %10 = arith.addf %8, %9 : vector<8x128xf32>
    %cst_8 = arith.constant 2.000000e+00 : f32
    %11 = vector.broadcast %cst_8 : f32 to vector<8x128xf32>
    %12 = arith.mulf %11, %5 : vector<8x128xf32>
    %13 = arith.subf %10, %12 : vector<8x128xf32>
    %cst_9 = arith.constant 9.99999996E-13 : f32
    %14 = vector.broadcast %cst_9 : f32 to vector<8x128xf32>
    %15 = arith.maximumf %13, %14 : vector<8x128xf32>
    %16 = math.sqrt %15 : vector<8x128xf32>
    %c0_10 = arith.constant 0 : index
    %c0_11 = arith.constant 0 : index
    %17 = vector.load %arg4[%c0_10, %c0_11] : memref<8x1xi32, #tpu.memory_space<vmem>>, vector<8x1xi32>
    %c0_12 = arith.constant 0 : index
    %c0_13 = arith.constant 0 : index
    %18 = vector.load %arg7[%c0_12, %c0_13] : memref<1x128xi32, #tpu.memory_space<vmem>>, vector<1x128xi32>
    %19 = vector.broadcast %17 : vector<8x1xi32> to vector<8x128xi32>
    %20 = vector.broadcast %18 : vector<1x128xi32> to vector<8x128xi32>
    %21 = arith.cmpi eq, %19, %20 : vector<8x128xi32>
    %c0_14 = arith.constant 0 : index
    %c0_15 = arith.constant 0 : index
    %22 = vector.load %arg9[%c0_14, %c0_15] : memref<1x128xf32, #tpu.memory_space<vmem>>, vector<1x128xf32>
    %cst_16 = arith.constant 0.000000e+00 : f32
    %23 = vector.broadcast %cst_16 : f32 to vector<8x128xf32>
    %24 = arith.select %21, %16, %23 : vector<8x128xi1>, vector<8x128xf32>
    %cst_17 = arith.constant dense<0.000000e+00> : vector<128xf32>
    %25 = vector.multi_reduction <add>, %24, %cst_17 [0] : vector<8x128xf32> to vector<128xf32>
    %26 = vector.shape_cast %25 : vector<128xf32> to vector<1x128xf32>
    %27 = arith.addf %22, %26 : vector<1x128xf32>
    %c0_18 = arith.constant 0 : index
    %c0_19 = arith.constant 0 : index
    %28 = vector.load %arg9[%c0_18, %c0_19] : memref<1x128xf32, #tpu.memory_space<vmem>>, vector<1x128xf32>
    tpu.vector_store %arg9[%c0_18, %c0_19], %27 {strides = array<i32>} : memref<1x128xf32, #tpu.memory_space<vmem>>, vector<1x128xf32>,
    %c0_i32_20 = arith.constant 0 : i32
    %29 = arith.cmpi eq, %arg1, %c0_i32_20 : i32
    %30 = arith.extui %29 : i1 to i32
    %c0_i32_21 = arith.constant 0 : i32
    %31 = arith.cmpi ne, %30, %c0_i32_21 : i32
    scf.if %31 {
      %c0_22 = arith.constant 0 : index
      %c0_23 = arith.constant 0 : index
      %32 = vector.load %arg9[%c0_22, %c0_23] : memref<1x128xf32, #tpu.memory_space<vmem>>, vector<1x128xf32>
      %33 = vector.shape_cast %32 : vector<1x128xf32> to vector<1x1x128xf32>
      %c0_24 = arith.constant 0 : index
      %c0_25 = arith.constant 0 : index
      %c0_26 = arith.constant 0 : index
      %34 = vector.load %arg8[%c0_24, %c0_25, %c0_26] : memref<1x1x128xf32, #tpu.memory_space<vmem>>, vector<1x1x128xf32>
      tpu.vector_store %arg8[%c0_24, %c0_25, %c0_26], %33 {strides = array<i32>} : memref<1x1x128xf32, #tpu.memory_space<vmem>>, vector<1x1x128xf32>,
    } else {
    }
    return
  }
  func.func @transform_0(%arg0: i32, %arg1: i32) -> (i32, i32) {
    %c1_i32 = arith.constant 1 : i32
    %0 = arith.muli %arg0, %c1_i32 : i32
    %1 = arith.addi %0, %arg1 : i32
    %c0_i32 = arith.constant 0 : i32
    %c0_i32_0 = arith.constant 0 : i32
    return %1, %c0_i32 : i32, i32
  }
  func.func @transform_1(%arg0: i32, %arg1: i32) -> (i32, i32) {
    %c1_i32 = arith.constant 1 : i32
    %0 = arith.muli %arg0, %c1_i32 : i32
    %1 = arith.addi %0, %arg1 : i32
    %c0_i32 = arith.constant 0 : i32
    %c0_i32_0 = arith.constant 0 : i32
    return %1, %c0_i32 : i32, i32
  }
  func.func @transform_2(%arg0: i32, %arg1: i32) -> (i32, i32) {
    %c1_i32 = arith.constant 1 : i32
    %0 = arith.muli %arg0, %c1_i32 : i32
    %1 = arith.addi %0, %arg1 : i32
    %c0_i32 = arith.constant 0 : i32
    %c0_i32_0 = arith.constant 0 : i32
    return %1, %c0_i32 : i32, i32
  }
  func.func @transform_3(%arg0: i32, %arg1: i32) -> (i32, i32) {
    %c0_i32 = arith.constant 0 : i32
    %c0_i32_0 = arith.constant 0 : i32
    %c0_i32_1 = arith.constant 0 : i32
    return %c0_i32, %c0_i32_0 : i32, i32
  }
  func.func @transform_4(%arg0: i32, %arg1: i32) -> (i32, i32) {
    %c0_i32 = arith.constant 0 : i32
    %c0_i32_0 = arith.constant 0 : i32
    %c0_i32_1 = arith.constant 0 : i32
    return %c0_i32, %c0_i32_0 : i32, i32
  }
  func.func @transform_5(%arg0: i32, %arg1: i32) -> (i32, i32) {
    %c0_i32 = arith.constant 0 : i32
    %c0_i32_0 = arith.constant 0 : i32
    %c0_i32_1 = arith.constant 0 : i32
    return %c0_i32, %c0_i32_0 : i32, i32
  }
  func.func @transform_6(%arg0: i32, %arg1: i32) -> (i32, i32, i32) {
    %c0_i32 = arith.constant 0 : i32
    %c0_i32_0 = arith.constant 0 : i32
    %c0_i32_1 = arith.constant 0 : i32
    return %arg0, %c0_i32, %c0_i32_0 : i32, i32, i32
  }
}

</mosaic_0001>

<bundles_post_ra>
// kernel: tpu_custom_call.1
= control target key start
LH: loop header
LB: loop body
LE: loop exit
PB: predicated region body
PF: predicated region fallthrough
CT: control target
= control target key end

     0   :  { %11 = vsyncpa [#allocation4], 0  ;;  %s1015_s0 = inlined_call_operand.vmem [shape: f32[16,128], index: 0, kind: input, shape index: {}]   ;;  %s1016_s1 = inlined_call_operand.vmem [shape: f32[16,1], index: 1, kind: input, shape index: {}]   ;;  %s1017_s2 = inlined_call_operand.vmem [shape: s32[16,1], index: 2, kind: input, shape index: {}]   ;;  %s1018_s3 = inlined_call_operand.hbm [shape: f32[128,128], index: 3, kind: input, shape index: {}]   ;;  %s1019_s4 = inlined_call_operand.vmem [shape: f32[1,128], index: 4, kind: input, shape index: {}]   ;;  %s1020_s5 = inlined_call_operand.vmem [shape: s32[1,128], index: 5, kind: input, shape index: {}]   ;;  %s1021_s6 = inlined_call_operand.hbm [shape: f32[2,1,128], index: 6, kind: output, shape index: {}]  }
   0x1   :  { %12 = vsyncpa [#allocation5], 0 }
   0x2   :  { %14 = vsyncpa [#allocation5 + $0x1], 0  ;;  %s872_s21 = smov 0   ;;  %s874_s22 = smov 0  }
   0x3   :  { %s876_s23 = smov 0   ;;  %s878_s24 = smov 0  }
   0x4   :  { %s880_s25 = smov 0   ;;  %s882_s26 = smov 0  }
   0x5 LB: > { %s581_s27 = sadd.s32 4294967295, %s828_s26   ;;  %s582_s28 = sadd.s32 4294967294, %s828_s26   ;;  %s828_s26 = sphi %s882_s26, %s20_s26   ;;  %s824_s25 = sphi %s880_s25, %s1030_s25   ;;  %s820_s24 = sphi %s878_s24, %s1029_s24   ;;  %s816_s23 = sphi %s876_s23, %s1028_s23   ;;  %s812_s22 = sphi %s874_s22, %s1027_s22   ;;  %s808_s21 = sphi %s872_s21, %s1026_s21  }
   0x6   : > { %s32_s29 = sadd.s32 1, %s824_s25  ;;  %s186_s30 = sadd.s32 1, %s816_s23 }
   0x7   : > { %p34_p0 = scmp.ge.s32.totalorder %s32_s29, 2  ;;  %p196_p1 = scmp.ne.s32.totalorder %s816_s23, %s812_s22 }
   0x8   : > { %p197_p2 = scmp.eq.s32.totalorder %s581_s27, 1  ;;  %p202_p3 = scmp.ne.s32.totalorder %s812_s22, %s808_s21 }
   0x9   : > { %s1032_s29 = smov (%p34_p0, %s32_s29), 0  ;;  %p203_p5 = scmp.eq.s32.totalorder %s582_s28, 1 }
   0xa   : > { %p912_p4 = por %p197_p2, %p196_p1  ;;  %s183_s8 = ssub.s32 %s824_s25, %s1032_s29 }
   0xb   : > { %p583_p6 = scmp.ge.s32.totalorder %s828_s26, 1  ;;  %p184_p7 = scmp.eq.s32.totalorder %s183_s8, 0 }
   0xc   : > { %p919_p8 = por %p203_p5, %p202_p3  ;;  %p210_p9 = scmp.lt.s32.totalorder %s828_s26, 3 }
   0xd   : > { %s925_s10 = scalar_select %p184_p7, %s816_s23, %s186_s30  }
   0xe   : > { %p927_p10 = pnand %p583_p6, %p210_p9  ;;  %p931_p11 = scmp.eq.s32.totalorder %s581_s27, 0 }
   0xf   : > { %s830_s13 = smov [#allocation3]  }
  0x10   : > { %p654_p12 = pneg %p927_p10  ;;  %s222_s14 = sshll.u32 %s830_s13, 4  ;;  %s223_s14 = int_to_ptr.vmem [resolvable:$true] %s222_s14 }
  0x11   : > { %s733_s15 = scalar_lea.vmem %s223_s14, 2048  ;;  %p741_p5 = scmp.lt.s32.totalorder %s223_s14, %s223_s14 }
  0x12   : > { %p655_p13 = pnand %p931_p11, %p654_p12  ;;  %p734_p1 = scmp.ne.s32.totalorder %s223_s14, %s733_s15 }
  0x13   : > { %p742_p6 = scmp.lt.s32.totalorder %s733_s15, %s733_s15 }
  0x14   : > { %p724_p0 = pneg %p655_p13 }
  0x15   : > { %p743_p7 = por %p742_p6, %p741_p5 }
  0x16   : > { %p736_p2 = pnand %p734_p1, %p724_p0 }
  0x18   : > { %p737_p3 = pneg %p736_p2 }
  0x1a   : > { %p744_p9 = pnand %p743_p7, %p737_p3 }
  0x1c   : > { %747 = shalt.err (!%p744_p9)
}
  0x1d   : > { %s831_s16 = smov 128   ;;  %s832_s17 = smov 8  }
  0x1e   : > { %657 = dma.hbm_to_vmem [thread:$0]  (!%p655_p13), %s1018_s3, 2048, %s223_s14, [#allocation4], %s831_s16, %s831_s16, %s832_s17  }
  0x1f   : > { %271 = sbr.rel (%p927_p10) target bundleno = 355 (0x163), region = 44 }
  0x24   : > { %799 = dma.done.wait (%p931_p11), [#allocation4], 2048  }
  0x25   : > { %801 = vsyncadd (%p931_p11), [#allocation4], 4294965248  ;;  %p311_p12 = scmp.lt.s32.totalorder %s820_s24, 1  ;;  %v833_v0 = vmov 0.0   ;;  %vm834_vm0 = vmmov 0   ;;  %v835_v1 = vmov 0  }
  0x26   : > { %613 = vmatprep.subr.mxu0 %v833_v0  ;;  %332 = vst [vmem:[#allocation2] sm:$0x1] %v833_v0  ;;  %645 = vmatprep.mubr.msk.f32.mxu0 %vm834_vm0, %v833_v0  ;;  %v349_v2 = vld [vmem:[#allocation3 + $0x78] sm:$0xff]  ;;  %v348_v3 = vld [vmem:[#allocation3 + $0x70] sm:$0xff]  ;;  %v347_v5 = vld [vmem:[#allocation3 + $0x68] sm:$0xff]  ;;  %s593_s28 = sshll.u32 %s820_s24, 4 }
  0x27   : > { %719 = vset.pattern.permute.xlu0 %v835_v1  ;;  %s312_s20 = scalar_select %p311_p12, %s820_s24, 1  ;;  %614 = vmatpush3.xpose.msra.mxu0 %v349_v2  ;;  %v346_v7 = vld [vmem:[#allocation3 + $0x60] sm:$0xff]  ;;  %v345_v8 = vld [vmem:[#allocation3 + $0x58] sm:$0xff]  ;;  %v344_v9 = vld [vmem:[#allocation3 + $0x50] sm:$0xff] }
  0x28   : > { %615 = vmatprep.subr.mxu0 %v833_v0  ;;  %v343_v10 = vld [vmem:[#allocation3 + $0x48] sm:$0xff]  ;;  %v342_v11 = vld [vmem:[#allocation3 + $0x40] sm:$0xff]  ;;  %v341_v12 = vld [vmem:[#allocation3 + $0x38] sm:$0xff] }
  0x29   : > { %s950_s27 = sshll.u32 %s312_s20, 3  ;;  %v340_v13 = vld [vmem:[#allocation3 + $0x30] sm:$0xff]  ;;  %v339_v14 = vld [vmem:[#allocation3 + $0x28] sm:$0xff]  ;;  %v338_v15 = vld [vmem:[#allocation3 + $0x20] sm:$0xff] }
  0x2a   : > { %s320_s8 = scalar_lea.vmem %s1016_s1, %s950_s27  ;;  %s326_s13 = scalar_lea.vmem %s1017_s2, %s950_s27  ;;  %v337_v16 = vld [vmem:[#allocation3 + $0x18] sm:$0xff]  ;;  %v336_v17 = vld [vmem:[#allocation3 + $0x10] sm:$0xff]  ;;  %v335_v18 = vld [vmem:[#allocation3 + $0x8] sm:$0xff] }
  0x2b   : > { %616 = vmatpush3.xpose.msra.mxu0 %v348_v3  ;;  %v420_v4 = vld [vmem:[%s320_s8] sm:$0xff]  ;;  %s314_s16 = scalar_lea.vmem %s1015_s0, %s950_s27  ;;  %s308_s27 = sand.u32 1, %s812_s22  }
  0x2c   : > { %617 = vmatprep.subr.mxu0 %v833_v0  ;;  %424 = vperm.xlu0 %719, %v420_v4   ;;  %v444_v6 = vld [vmem:[%s326_s13] sm:$0xff]  ;;  %s309_s30 = scalar_lea.vmem [#allocation6], %s308_s27  ;;  %s975_s13 = scalar_lea.hbm %s1021_s6, %s593_s28 }
  0x2d   : > { %v334_v19 = vld [vmem:[#allocation3] sm:$0xff]  ;;  %v591_v21 = vld [vmem:[%s1019_s4] ss:$0 sm:$0xff]  ;;  %s482_s8 = sshll.u32 %s309_s30, 4  ;;  %s470_s14 = scalar_lea.sflag [#allocation5], %s308_s27  ;;  %s483_s8 = int_to_ptr.vmem [resolvable:$true] %s482_s8 }
  0x2e   : > { %v333_v20 = vld [vmem:[%s314_s16] sm:$0xff]  ;;  %s748_s15 = scalar_lea.vmem %s483_s8, 16  ;;  %s836_s16 = smov [#allocation6]  }
  0x2f   : > { %618 = vmatpush3.xpose.msra.mxu0 %v347_v5  ;;  %v592_v30 = vld [vmem:[%s1020_s5] ss:$0 sm:$0xff]  ;;  %p749_p10 = scmp.ne.s32.totalorder %s483_s8, %s748_s15  ;;  %s752_s17 = sshll.u32 %s836_s16, 4  ;;  %s753_s17 = int_to_ptr.vmem [resolvable:$false] %s752_s17 }
  0x30   : > { %619 = vmatprep.subr.mxu0 %v833_v0  ;;  %447 = vperm.xlu0 %719, %v444_v6   ;;  %v454_v42 = vld [vmem:[#allocation2] sm:$0x1]  ;;  %s754_s24 = scalar_lea.vmem %s753_s17, 32  ;;  %p755_p0 = scmp.lt.s32.totalorder %s483_s8, %s753_s17 }
  0x31   : > { %p750_p11 = pnand %p749_p10, %p912_p4  ;;  %p756_p1 = scmp.lt.s32.totalorder %s754_s24, %s748_s15 }
  0x33   : > { %620 = vmatpush3.xpose.msra.mxu0 %v346_v7  ;;  %p751_p13 = pneg %p750_p11  ;;  %p757_p2 = por %p756_p1, %p755_p0 }
  0x34   : > { %621 = vmatprep.subr.mxu0 %v833_v0 }
  0x35   : > { %p758_p3 = pnand %p757_p2, %p751_p13 }
  0x37   : > { %622 = vmatpush3.xpose.msra.mxu0 %v345_v8 }
  0x38   : > { %623 = vmatprep.subr.mxu0 %v833_v0 }
  0x3b   : > { %624 = vmatpush3.xpose.msra.mxu0 %v344_v9 }
  0x3c   : > { %625 = vmatprep.subr.mxu0 %v833_v0 }
  0x3f   : > { %626 = vmatpush3.xpose.msra.mxu0 %v343_v10 }
  0x40   : > { %627 = vmatprep.subr.mxu0 %v833_v0 }
  0x43   : > { %628 = vmatpush3.xpose.msra.mxu0 %v342_v11 }
  0x44   : > { %629 = vmatprep.subr.mxu0 %v833_v0 }
  0x47   : > { %630 = vmatpush3.xpose.msra.mxu0 %v341_v12 }
  0x48   : > { %631 = vmatprep.subr.mxu0 %v833_v0 }
  0x4b   : > { %632 = vmatpush3.xpose.msra.mxu0 %v340_v13 }
  0x4c   : > { %633 = vmatprep.subr.mxu0 %v833_v0 }
  0x4f   : > { %634 = vmatpush3.xpose.msra.mxu0 %v339_v14 }
  0x50   : > { %635 = vmatprep.subr.mxu0 %v833_v0 }
  0x53   : > { %636 = vmatpush3.xpose.msra.mxu0 %v338_v15 }
  0x54   : > { %637 = vmatprep.subr.mxu0 %v833_v0 }
  0x57   : > { %638 = vmatpush3.xpose.msra.mxu0 %v337_v16 }
  0x58   : > { %639 = vmatprep.subr.mxu0 %v833_v0 }
  0x5b   : > { %640 = vmatpush3.xpose.msra.mxu0 %v336_v17 }
  0x5c   : > { %641 = vmatprep.subr.mxu0 %v833_v0 }
  0x5f   : > { %642 = vmatpush3.xpose.msra.mxu0 %v335_v18 }
  0x60   : > { %643 = vmatprep.subr.mxu0 %v833_v0 }
  0x63   : > { %644 = vmatpush3.xpose.msra.mxu0 %v334_v19 }
  0x66   : > { %646 = vmatmul.mubr.f32.vlgmr.msra.gmra.mxu0 %v333_v20 }
  0xa7   : > { %v425_v22 = vpop.permute.xlu0 %424 }
  0xa8   : > { %v433_v23 = vadd.f32 %v591_v21, %v425_v22 }
  0xab   : > { %v448_v31 = vpop.permute.xlu0 %447 }
  0xac   : > { %vm453_vm3 = vcmp.eq.s32.totalorder %v448_v31, %v592_v30 }
 0x126   : > { %v416_v24 = vpop.f32.mrf.mxu0 }
 0x127   : > { %v434_v25 = vmul.f32 2.0, %v416_v24 }
 0x128   : > { %v647_v26 = vpop.f32.mrf.mxu0 }
 0x129   : > { %v435_v27 = vsub.f32 %v433_v23, %v434_v25 }
 0x12b   : > { %v436_v28 = vmax.f32 %v435_v27, 1e-12 }
 0x12d   : > { %720 = vrsqrt.f32 %v436_v28  ;;  %vm439_vm1 = vcmp.eq.f32.partialorder %v436_v28, inf  ;;  %v442_v33 = vand.u32 2147483648, %v436_v28  ;;  %vm441_vm2 = vcmp.eq.f32.partialorder %v436_v28, 0.0 }
 0x13a   : > { %v721_v29 = vpop.eup %720 }
 0x13b   : > { %v438_v32 = vmul.f32 %v721_v29, %v436_v28 }
 0x13d   : > { %v440_v34 = vsel %vm439_vm1, %v436_v28, %v438_v32 }
 0x13e   : > { %v443_v35 = vsel %vm441_vm2, %v442_v33, %v440_v34 }
 0x13f   : > { %v455_v36 = vsel %vm453_vm3, %v443_v35, 0.0 }
 0x140   : > { %v456_v37 = vrot.slane %v455_v36, 4 }
 0x142   : > { %v457_v38 = vadd.f32 %v456_v37, %v455_v36 }
 0x144   : > { %v458_v39 = vrot.slane %v457_v38, 2 }
 0x146   : > { %v459_v40 = vadd.f32 %v458_v39, %v457_v38 }
 0x148   : > { %v460_v41 = vrot.slane %v459_v40, 1 }
 0x14a   : > { %v461_v43 = vadd.f32 %v460_v41, %v459_v40 }
 0x14c   : > { %v462_v44 = vadd.f32 %v461_v43, %v454_v42 }
 0x14e   : > { %463 = vst [vmem:[#allocation2] sm:$0x1] %v462_v44 }
 0x155   : > { %v467_v45 = vld [vmem:[#allocation2] sm:$0x1] }
 0x156   : > { %468 = vst [vmem:[%s309_s30] sm:$0x1] %v467_v45 }
 0x157   : > { %761 = shalt.err (!%p758_p3)
}
 0x158   : > { %s762_s18 = scalar_lea.hbm %s975_s13, 16  ;;  %s766_s27 = scalar_lea.hbm %s1021_s6, 32 }
 0x159   : > { %p763_p5 = scmp.ne.s32.totalorder %s975_s13, %s762_s18  ;;  %p767_p9 = scmp.lt.s32.totalorder %s975_s13, %s1021_s6 }
 0x15a   : > { %p768_p12 = scmp.lt.s32.totalorder %s766_s27, %s762_s18 }
 0x15b   : > { %p764_p6 = pnand %p763_p5, %p912_p4 }
 0x15c   : > { %p769_p10 = por %p768_p12, %p767_p9 }
 0x15d   : > { %p765_p7 = pneg %p764_p6 }
 0x15f   : > { %p770_p11 = pnand %p769_p10, %p765_p7 }
 0x161   : > { %773 = shalt.err (!%p770_p11)
}
 0x162   : > { %652 = dma.vmem_to_hbm [thread:$0]  (%p912_p4), %s483_s8, 16, %s975_s13, %s470_s14  }
 0x163 PF: > { %p664_p13 = scmp.ge.s32.totalorder %s828_s26, 2  ;;  %s494_s11 = sand.u32 1, %s808_s21  }
 0x164   : > { %s495_s12 = scalar_lea.sflag [#allocation5], %s494_s11 }
 0x165   : > { %p659_p0 = pnand %p664_p13, %p919_p8 }
 0x167   : > { %p660_p1 = pneg %p659_p0 }
 0x169   : > { %803 = dma.done.wait (%p660_p1), %s495_s12, 16  }
 0x16a   : > { %805 = vsyncadd (%p660_p1), %s495_s12, 4294967280  ;;  %s20_s26 = sadd.s32 1, %s828_s26   ;;  %s1026_s21 = smov %s812_s22 }
 0x16b   : > { %p17_p2 = scmp.ge.s32.totalorder %s20_s26, 4   ;;  %s1027_s22 = smov %s816_s23 }
 0x16c   : > { %s1028_s23 = smov %s925_s10  ;;  %s1029_s24 = smov %s824_s25 }
 0x16d   : > { %s1030_s25 = smov %s1032_s29  ;;  %19 = sbr.rel (!%p17_p2) target bundleno = 5 (0x5), region = 98 }
 0x172   :  { %499 = vsyncpa [#allocation4], 1 }
 0x173   :  { %501 = vsyncpa [#allocation4 + $0x1], 1 }
 0x174   :  { %502 = vsyncpa [#allocation5], 1 }
 0x175   :  { %504 = vsyncpa [#allocation5 + $0x1], 1 }

</bundles_post_ra>
